<compile_context>
chip_gen: v6e
topology: v6e:2x2x1
jax: 0.10.0
libtpu: 0.0.40
codegen_flags: <defaults>
</compile_context>

<pallas_src>
import functools

import jax
import jax.numpy as jnp
from jax import lax
from jax.experimental import pallas as pl
from jax.experimental.pallas import tpu as pltpu

_LANE = 128
_SUB = 8
_UNIT = _SUB * _LANE            # 1024 elements = one (8,128) vreg of f32
_TILE_CAP = 32 * _UNIT          # 32768 spatial elements per grid step


def _dice_kernel(pred_ref, mask_ref, out_ref, *, hw, tile_hw, r_tile, needs_mask):
    t = pl.program_id(1)

    # Zero the per-batch accumulator block at the start of each batch's
    # spatial loop (output block is resident across the "arbitrary" t axis).
    @pl.when(t == 0)
    def _():
        out_ref[...] = jnp.zeros_like(out_ref)

    x = pred_ref[0].astype(jnp.float32)            # (C, R_TILE, 128)

    # softmax(x, axis=0)[1] == 1 / sum_c exp(x_c - x_1)   (denom >= 1)
    x1 = x[1:2]                                    # (1, R_TILE, 128)
    e = jnp.exp(x - x1)                            # (C, R_TILE, 128)
    denom = jnp.sum(e, axis=0)                     # (R_TILE, 128) cross-vreg VPU adds
    p1 = pl.reciprocal(denom, approx=False)        # (R_TILE, 128) = pred_masks tile

    msk = mask_ref[0].astype(jnp.float32)          # (R_TILE, 128)
    overlap = p1 * msk

    if needs_mask:
        # Zero out spatial padding in sum(pred_masks); masks are zero-padded
        # already so sum(masks) / sum(overlap) are unaffected.
        rows = lax.broadcasted_iota(jnp.int32, (r_tile, _LANE), 0)
        lanes = lax.broadcasted_iota(jnp.int32, (r_tile, _LANE), 1)
        gidx = t * tile_hw + rows * _LANE + lanes
        p1_sum = jnp.where(gidx < hw, p1, 0.0)
    else:
        p1_sum = p1

    # Fold (R_TILE, 128) -> (8, 128): whole-vreg regrouping + elementwise adds
    # (pure VPU, no per-step cross-lane reduction).
    def fold(v):
        return v.reshape(r_tile // _SUB, _SUB, _LANE).sum(axis=0)

    out_ref[0, 0] = out_ref[0, 0] + fold(p1_sum)      # partial sum(pred_masks)
    out_ref[0, 1] = out_ref[0, 1] + fold(msk)         # partial sum(masks)
    out_ref[0, 2] = out_ref[0, 2] + fold(overlap)     # partial sum(overlap)


def dice_loss(pred, masks):
    """pred: (N, C, H, W); masks: (N, H, W). Returns scalar Dice loss."""
    N, C, H, W = pred.shape
    assert C >= 2, "Diceloss extracts channel 1 of the softmax; need C >= 2"
    assert masks.shape == (N, H, W)

    HW = H * W
    hw_unit = -(-HW // _UNIT) * _UNIT              # round up to multiple of 1024
    tile_hw = min(hw_unit, _TILE_CAP)              # multiple of 1024
    G = -(-HW // tile_hw)
    HW_pad = G * tile_hw
    r_tile = tile_hw // _LANE                      # rows per grid step (mult of 8)
    total_rows = HW_pad // _LANE
    needs_mask = HW_pad != HW

    pred2 = pred.reshape(N, C, HW)
    masks2 = masks.reshape(N, HW)
    if needs_mask:
        pad = HW_pad - HW
        pred2 = jnp.pad(pred2, ((0, 0), (0, 0), (0, pad)))
        masks2 = jnp.pad(masks2, ((0, 0), (0, pad)))
    pred3 = pred2.reshape(N, C, total_rows, _LANE)
    masks3 = masks2.reshape(N, total_rows, _LANE)

    kernel = functools.partial(
        _dice_kernel, hw=HW, tile_hw=tile_hw, r_tile=r_tile, needs_mask=needs_mask
    )

    partials = pl.pallas_call(
        kernel,
        out_shape=jax.ShapeDtypeStruct((N, 3, _SUB, _LANE), jnp.float32),
        grid_spec=pltpu.PrefetchScalarGridSpec(
            num_scalar_prefetch=0,
            grid=(N, G),
            in_specs=[
                pl.BlockSpec((1, C, r_tile, _LANE), lambda b, t: (b, 0, t, 0)),
                pl.BlockSpec((1, r_tile, _LANE), lambda b, t: (b, t, 0)),
            ],
            out_specs=pl.BlockSpec((1, 3, _SUB, _LANE), lambda b, t: (b, 0, 0, 0)),
        ),
        compiler_params=pltpu.CompilerParams(
            dimension_semantics=("parallel", "arbitrary"),
            vmem_limit_bytes=32 * 1024 * 1024,
        ),
    )(pred3, masks3)

    sums = jnp.sum(partials, axis=(0, 2, 3))       # (3,) tiny final reduction in XLA
    area_pred, area_masks, area_overlap = sums[0], sums[1], sums[2]
    return 1.0 - (2.0 * area_overlap + 1.0) / (area_pred + area_masks + 1.0)


def dice_loss_ref(pred, masks):
    """Pure-JAX reference mirroring the PyTorch forward."""
    p = jax.nn.softmax(pred.astype(jnp.float32), axis=1)
    pm = p[:, 1, :, :]
    overlap = pm * masks
    return 1.0 - (2.0 * jnp.sum(overlap) + 1.0) / (jnp.sum(pm) + jnp.sum(masks) + 1.0)


if __name__ == "__main__":
    key = jax.random.PRNGKey(0)
    k1, k2 = jax.random.split(key)

    N, C, H, W = 2, 4, 16, 16
    pred = jax.random.normal(k1, (N, C, H, W), dtype=jnp.float32)
    masks = (jax.random.uniform(k2, (N, H, W)) > 0.5).astype(jnp.float32)

    loss = dice_loss(pred, masks)
    jax.block_until_ready(loss)

    ref = dice_loss_ref(pred, masks)
    assert jnp.allclose(loss, ref, atol=1e-5, rtol=1e-5), (loss, ref)

    print("KERNEL_OK")
</pallas_src>

<mosaic_0001>
module attributes {stable_mosaic.version = 11 : i64} {
  func.func @_dice_kernel(%arg0: i32, %arg1: i32, %arg2: memref<1x4x8x128xf32, #tpu.memory_space<vmem>>, %arg3: memref<1x8x128xf32, #tpu.memory_space<vmem>>, %arg4: memref<1x3x8x128xf32, #tpu.memory_space<vmem>>) attributes {dimension_semantics = [#tpu.dimension_semantics<parallel>, #tpu.dimension_semantics<arbitrary>], iteration_bounds = array<i64: 2, 1>, scalar_prefetch = 0 : i64, scratch_operands = 0 : i64, tpu.core_type = #tpu.core_type<tc>, window_params = [{transform_indices = @transform_0, window_bounds = array<i64: 1, 4, 8, 128>}, {transform_indices = @transform_1, window_bounds = array<i64: 1, 8, 128>}, {transform_indices = @transform_2, window_bounds = array<i64: 1, 3, 8, 128>}]} {
    %c0_i32 = arith.constant 0 : i32
    %0 = arith.cmpi eq, %arg1, %c0_i32 : i32
    %1 = arith.extui %0 : i1 to i32
    %c0_i32_0 = arith.constant 0 : i32
    %2 = arith.cmpi ne, %1, %c0_i32_0 : i32
    scf.if %2 {
      %cst_33 = arith.constant 0.000000e+00 : f32
      %50 = vector.broadcast %cst_33 : f32 to vector<1x3x8x128xf32>
      %c0_34 = arith.constant 0 : index
      %c0_35 = arith.constant 0 : index
      %c0_36 = arith.constant 0 : index
      %c0_37 = arith.constant 0 : index
      %51 = vector.load %arg4[%c0_34, %c0_35, %c0_36, %c0_37] : memref<1x3x8x128xf32, #tpu.memory_space<vmem>>, vector<1x3x8x128xf32>
      tpu.vector_store %arg4[%c0_34, %c0_35, %c0_36, %c0_37], %50 {strides = array<i32>} : memref<1x3x8x128xf32, #tpu.memory_space<vmem>>, vector<1x3x8x128xf32>,
    } else {
    }
    %c0 = arith.constant 0 : index
    %c0_1 = arith.constant 0 : index
    %c0_2 = arith.constant 0 : index
    %c0_3 = arith.constant 0 : index
    %3 = vector.load %arg2[%c0, %c0_1, %c0_2, %c0_3] : memref<1x4x8x128xf32, #tpu.memory_space<vmem>>, vector<1x4x8x128xf32>
    %4 = vector.shape_cast %3 : vector<1x4x8x128xf32> to vector<4x8x128xf32>
    %5 = vector.extract_strided_slice %4 {offsets = [1, 0, 0], sizes = [1, 8, 128], strides = [1, 1, 1]} : vector<4x8x128xf32> to vector<1x8x128xf32>
    %6 = vector.broadcast %5 : vector<1x8x128xf32> to vector<4x8x128xf32>
    %7 = arith.subf %4, %6 : vector<4x8x128xf32>
    %8 = math.exp %7 : vector<4x8x128xf32>
    %cst = arith.constant dense<0.000000e+00> : vector<8x128xf32>
    %9 = vector.multi_reduction <add>, %8, %cst [0] : vector<4x8x128xf32> to vector<8x128xf32>
    %10 = tpu.reciprocal %9 : vector<8x128xf32> -> vector<8x128xf32>
    %c0_4 = arith.constant 0 : index
    %c0_5 = arith.constant 0 : index
    %c0_6 = arith.constant 0 : index
    %11 = vector.load %arg3[%c0_4, %c0_5, %c0_6] : memref<1x8x128xf32, #tpu.memory_space<vmem>>, vector<1x8x128xf32>
    %12 = vector.shape_cast %11 : vector<1x8x128xf32> to vector<8x128xf32>
    %13 = arith.mulf %10, %12 : vector<8x128xf32>
    %14 = tpu.iota {dimensions = array<i32: 0>} : vector<8x128xi32>
    %15 = tpu.iota {dimensions = array<i32: 1>} : vector<8x128xi32>
    %c1024_i32 = arith.constant 1024 : i32
    %16 = arith.muli %arg1, %c1024_i32 : i32
    %c128_i32 = arith.constant 128 : i32
    %17 = vector.broadcast %c128_i32 : i32 to vector<8x128xi32>
    %18 = arith.muli %14, %17 : vector<8x128xi32>
    %19 = vector.broadcast %16 : i32 to vector<8x128xi32>
    %20 = arith.addi %19, %18 : vector<8x128xi32>
    %21 = arith.addi %20, %15 : vector<8x128xi32>
    %c256_i32 = arith.constant 256 : i32
    %22 = vector.broadcast %c256_i32 : i32 to vector<8x128xi32>
    %23 = arith.cmpi slt, %21, %22 : vector<8x128xi32>
    %cst_7 = arith.constant 0.000000e+00 : f32
    %24 = vector.broadcast %cst_7 : f32 to vector<8x128xf32>
    %25 = arith.select %23, %10, %24 : vector<8x128xi1>, vector<8x128xf32>
    %c0_8 = arith.constant 0 : index
    %c0_9 = arith.constant 0 : index
    %c0_10 = arith.constant 0 : index
    %c0_11 = arith.constant 0 : index
    %26 = vector.load %arg4[%c0_8, %c0_9, %c0_10, %c0_11] : memref<1x3x8x128xf32, #tpu.memory_space<vmem>>, vector<1x1x8x128xf32>
    %27 = vector.shape_cast %26 : vector<1x1x8x128xf32> to vector<8x128xf32>
    %28 = vector.shape_cast %25 : vector<8x128xf32> to vector<1x8x128xf32>
    %cst_12 = arith.constant dense<0.000000e+00> : vector<8x128xf32>
    %29 = vector.multi_reduction <add>, %28, %cst_12 [0] : vector<1x8x128xf32> to vector<8x128xf32>
    %30 = arith.addf %27, %29 : vector<8x128xf32>
    %c0_13 = arith.constant 0 : index
    %c0_14 = arith.constant 0 : index
    %c0_15 = arith.constant 0 : index
    %c0_16 = arith.constant 0 : index
    %31 = vector.load %arg4[%c0_13, %c0_14, %c0_15, %c0_16] : memref<1x3x8x128xf32, #tpu.memory_space<vmem>>, vector<1x1x8x128xf32>
    %32 = vector.shape_cast %31 : vector<1x1x8x128xf32> to vector<8x128xf32>
    %33 = vector.shape_cast %30 : vector<8x128xf32> to vector<1x1x8x128xf32>
    tpu.vector_store %arg4[%c0_13, %c0_14, %c0_15, %c0_16], %33 {strides = array<i32>} : memref<1x3x8x128xf32, #tpu.memory_space<vmem>>, vector<1x1x8x128xf32>,
    %c0_17 = arith.constant 0 : index
    %c1 = arith.constant 1 : index
    %c0_18 = arith.constant 0 : index
    %c0_19 = arith.constant 0 : index
    %34 = vector.load %arg4[%c0_17, %c1, %c0_18, %c0_19] : memref<1x3x8x128xf32, #tpu.memory_space<vmem>>, vector<1x1x8x128xf32>
    %35 = vector.shape_cast %34 : vector<1x1x8x128xf32> to vector<8x128xf32>
    %36 = vector.shape_cast %12 : vector<8x128xf32> to vector<1x8x128xf32>
    %cst_20 = arith.constant dense<0.000000e+00> : vector<8x128xf32>
    %37 = vector.multi_reduction <add>, %36, %cst_20 [0] : vector<1x8x128xf32> to vector<8x128xf32>
    %38 = arith.addf %35, %37 : vector<8x128xf32>
    %c0_21 = arith.constant 0 : index
    %c1_22 = arith.constant 1 : index
    %c0_23 = arith.constant 0 : index
    %c0_24 = arith.constant 0 : index
    %39 = vector.load %arg4[%c0_21, %c1_22, %c0_23, %c0_24] : memref<1x3x8x128xf32, #tpu.memory_space<vmem>>, vector<1x1x8x128xf32>
    %40 = vector.shape_cast %39 : vector<1x1x8x128xf32> to vector<8x128xf32>
    %41 = vector.shape_cast %38 : vector<8x128xf32> to vector<1x1x8x128xf32>
    tpu.vector_store %arg4[%c0_21, %c1_22, %c0_23, %c0_24], %41 {strides = array<i32>} : memref<1x3x8x128xf32, #tpu.memory_space<vmem>>, vector<1x1x8x128xf32>,
    %c0_25 = arith.constant 0 : index
    %c2 = arith.constant 2 : index
    %c0_26 = arith.constant 0 : index
    %c0_27 = arith.constant 0 : index
    %42 = vector.load %arg4[%c0_25, %c2, %c0_26, %c0_27] : memref<1x3x8x128xf32, #tpu.memory_space<vmem>>, vector<1x1x8x128xf32>
    %43 = vector.shape_cast %42 : vector<1x1x8x128xf32> to vector<8x128xf32>
    %44 = vector.shape_cast %13 : vector<8x128xf32> to vector<1x8x128xf32>
    %cst_28 = arith.constant dense<0.000000e+00> : vector<8x128xf32>
    %45 = vector.multi_reduction <add>, %44, %cst_28 [0] : vector<1x8x128xf32> to vector<8x128xf32>
    %46 = arith.addf %43, %45 : vector<8x128xf32>
    %c0_29 = arith.constant 0 : index
    %c2_30 = arith.constant 2 : index
    %c0_31 = arith.constant 0 : index
    %c0_32 = arith.constant 0 : index
    %47 = vector.load %arg4[%c0_29, %c2_30, %c0_31, %c0_32] : memref<1x3x8x128xf32, #tpu.memory_space<vmem>>, vector<1x1x8x128xf32>
    %48 = vector.shape_cast %47 : vector<1x1x8x128xf32> to vector<8x128xf32>
    %49 = vector.shape_cast %46 : vector<8x128xf32> to vector<1x1x8x128xf32>
    tpu.vector_store %arg4[%c0_29, %c2_30, %c0_31, %c0_32], %49 {strides = array<i32>} : memref<1x3x8x128xf32, #tpu.memory_space<vmem>>, vector<1x1x8x128xf32>,
    return
  }
  func.func @transform_0(%arg0: i32, %arg1: i32) -> (i32, i32, i32, i32) {
    %c0_i32 = arith.constant 0 : i32
    %c0_i32_0 = arith.constant 0 : i32
    %c0_i32_1 = arith.constant 0 : i32
    return %arg0, %c0_i32, %arg1, %c0_i32_0 : i32, i32, i32, i32
  }
  func.func @transform_1(%arg0: i32, %arg1: i32) -> (i32, i32, i32) {
    %c0_i32 = arith.constant 0 : i32
    %c0_i32_0 = arith.constant 0 : i32
    return %arg0, %arg1, %c0_i32 : i32, i32, i32
  }
  func.func @transform_2(%arg0: i32, %arg1: i32) -> (i32, i32, i32, i32) {
    %c0_i32 = arith.constant 0 : i32
    %c0_i32_0 = arith.constant 0 : i32
    %c0_i32_1 = arith.constant 0 : i32
    %c0_i32_2 = arith.constant 0 : i32
    return %arg0, %c0_i32, %c0_i32_0, %c0_i32_1 : i32, i32, i32, i32
  }
}

</mosaic_0001>

<bundles_post_ra>
// kernel: tpu_custom_call.1
= control target key start
LH: loop header
LB: loop body
LE: loop exit
PB: predicated region body
PF: predicated region fallthrough
CT: control target
= control target key end

     0   :  { %7 = vsyncpa [#allocation3], 0  ;;  %s837_s0 = inlined_call_operand.hbm [shape: f32[2,4,8,128], index: 0, kind: input, shape index: {}]   ;;  %s838_s1 = inlined_call_operand.hbm [shape: f32[2,8,128], index: 1, kind: input, shape index: {}]   ;;  %s839_s2 = inlined_call_operand.hbm [shape: f32[2,3,8,128], index: 2, kind: output, shape index: {}]  }
   0x1   :  { %9 = vsyncpa [#allocation3 + $0x1], 0 }
   0x2   :  { %10 = vsyncpa [#allocation6], 0 }
   0x3   :  { %12 = vsyncpa [#allocation6 + $0x1], 0 }
   0x4   :  { %13 = vsyncpa [#allocation4], 0 }
   0x5   :  { %15 = vsyncpa [#allocation4 + $0x1], 0  ;;  %s660_s9 = smov 0   ;;  %s662_s10 = smov 0  }
   0x6   :  { %s664_s11 = smov 0   ;;  %s666_s12 = smov 0  }
   0x7   :  { %s668_s13 = smov 0   ;;  %s670_s14 = smov 0  }
   0x8 LB: > { %s392_s15 = sadd.s32 4294967295, %s636_s14   ;;  %s393_s16 = sadd.s32 4294967294, %s636_s14   ;;  %s636_s14 = sphi %s670_s14, %s21_s14   ;;  %s632_s13 = sphi %s668_s13, %s850_s13   ;;  %s628_s12 = sphi %s666_s12, %s849_s12   ;;  %s624_s11 = sphi %s664_s11, %s848_s11   ;;  %s620_s10 = sphi %s662_s10, %s847_s10   ;;  %s616_s9 = sphi %s660_s9, %s846_s9  }
   0x9   : > { %s33_s17 = sadd.s32 1, %s632_s13  ;;  %s42_s18 = sadd.s32 1, %s624_s11 }
   0xa   : > { %p35_p0 = scmp.ge.s32.totalorder %s33_s17, 2  ;;  %p49_p1 = scmp.ne.s32.totalorder %s624_s11, %s620_s10 }
   0xb   : > { %p50_p2 = scmp.eq.s32.totalorder %s636_s14, 0  ;;  %p55_p3 = scmp.ne.s32.totalorder %s620_s10, %s616_s9 }
   0xc   : > { %s852_s17 = smov (%p35_p0, %s33_s17), 0  ;;  %p56_p5 = scmp.eq.s32.totalorder %s392_s15, 0 }
   0xd   : > { %p701_p4 = por %p50_p2, %p49_p1  ;;  %s37_s20 = ssub.s32 %s632_s13, %s852_s17 }
   0xe   : > { %p107_p6 = scmp.eq.s32.totalorder %s392_s15, 1  ;;  %p40_p7 = scmp.eq.s32.totalorder %s37_s20, 0 }
   0xf   : > { %p707_p8 = por %p56_p5, %p55_p3  ;;  %p113_p10 = scmp.eq.s32.totalorder %s393_s16, 1 }
  0x10   : > { %p711_p9 = por %p107_p6, %p49_p1  ;;  %p395_p12 = scmp.ge.s32.totalorder %s636_s14, 2 }
  0x11   : > { %s716_s23 = scalar_select %p40_p7, %s624_s11, %s42_s18  }
  0x12   : > { %p718_p11 = por %p113_p10, %p55_p3  ;;  %p431_p13 = scmp.lt.s32.totalorder %s636_s14, 2 }
  0x13   : > { %s725_s25 = sand.u32 1, %s624_s11   ;;  %s411_s27 = sshll.u32 %s632_s13, 9 }
  0x14   : > { %s396_s26 = sshll.u32 %s725_s25, 5  ;;  %s144_s30 = scalar_lea.hbm %s837_s0, %s411_s27 }
  0x15   : > { %s137_s3 = scalar_lea.vmem [#allocation2], %s396_s26  ;;  %p734_p0 = pnand %p431_p13, %p701_p4 }
  0x16   : > { %s145_s4 = sshll.u32 %s137_s3, 4  ;;  %p401_p1 = scmp.ge.s32.totalorder %s636_s14, 1  ;;  %s146_s4 = int_to_ptr.vmem [resolvable:$true] %s145_s4 }
  0x17   : > { %s134_s6 = scalar_lea.sflag [#allocation3], %s725_s25  ;;  %p498_p2 = pneg %p734_p0 }
  0x18   : > { %s509_s7 = scalar_lea.vmem %s146_s4, 512  ;;  %s638_s8 = smov [#allocation2]  }
  0x19   : > { %p510_p3 = scmp.ne.s32.totalorder %s146_s4, %s509_s7  ;;  %s514_s15 = sshll.u32 %s638_s8, 4  ;;  %s515_s15 = int_to_ptr.vmem [resolvable:$false] %s514_s15 }
  0x1a   : > { %s516_s16 = scalar_lea.vmem %s515_s15, 1024  ;;  %p517_p4 = scmp.lt.s32.totalorder %s146_s4, %s515_s15 }
  0x1b   : > { %p512_p5 = pnand %p510_p3, %p498_p2  ;;  %p518_p7 = scmp.lt.s32.totalorder %s516_s16, %s509_s7 }
  0x1d   : > { %p513_p6 = pneg %p512_p5  ;;  %p519_p10 = por %p518_p7, %p517_p4 }
  0x1f   : > { %p520_p13 = pnand %p519_p10, %p513_p6 }
  0x21   : > { %523 = shalt.err (!%p520_p13)
}
  0x22   : > { %s639_s18 = smov 128   ;;  %s640_s19 = smov 8  }
  0x23   : > { %423 = dma.hbm_to_vmem [thread:$0]  (!%p734_p0), %s144_s30, 512, %s146_s4, %s134_s6, %s639_s18, %s639_s18, %s640_s19  }
  0x24   : > { %p172_p3 = scmp.lt.s32.totalorder %s636_s14, 3  ;;  %s399_s20 = sshll.u32 %s725_s25, 3 }
  0x25   : > { %s400_s26 = sshll.u32 %s632_s13, 7  ;;  %s159_s7 = scalar_lea.vmem [#allocation5], %s399_s20 }
  0x26   : > { %p752_p5 = pnand %p401_p1, %p172_p3  ;;  %s165_s3 = scalar_lea.hbm %s838_s1, %s400_s26 }
  0x27   : > { %s167_s8 = sshll.u32 %s159_s7, 4  ;;  %s156_s15 = scalar_lea.sflag [#allocation6], %s725_s25  ;;  %s168_s8 = int_to_ptr.vmem [resolvable:$true] %s167_s8 }
  0x28   : > { %s537_s16 = scalar_lea.vmem %s168_s8, 128  ;;  %s641_s30 = smov [#allocation5]  }
  0x29   : > { %p538_p6 = scmp.ne.s32.totalorder %s168_s8, %s537_s16  ;;  %s542_s4 = sshll.u32 %s641_s30, 4  ;;  %s543_s4 = int_to_ptr.vmem [resolvable:$false] %s542_s4 }
  0x2a   : > { %s544_s6 = scalar_lea.vmem %s543_s4, 256  ;;  %p545_p1 = scmp.lt.s32.totalorder %s168_s8, %s543_s4 }
  0x2b   : > { %p540_p4 = pnand %p538_p6, %p498_p2  ;;  %p546_p10 = scmp.lt.s32.totalorder %s544_s6, %s537_s16 }
  0x2d   : > { %p541_p7 = pneg %p540_p4  ;;  %p547_p13 = por %p546_p10, %p545_p1 }
  0x2f   : > { %p548_p3 = pnand %p547_p13, %p541_p7 }
  0x31   : > { %551 = shalt.err (!%p548_p3)
}
  0x32   : > { %426 = dma.hbm_to_vmem [thread:$0]  (!%p734_p0), %s165_s3, 128, %s168_s8, %s156_s15  }
  0x33   : > { %176 = sbr.rel (%p752_p5) target bundleno = 116 (0x74), region = 28  ;;  %s768_s25 = sand.u32 (!%p752_p5), 1, %s620_s10  }
  0x34   : > { %s402_s18 = sshll.u32 (!%p752_p5), %s768_s25, 5  ;;  %s179_s19 = scalar_lea.sflag (!%p752_p5), [#allocation3], %s768_s25 }
  0x35   : > { %s182_s20 = scalar_lea.vmem (!%p752_p5), [#allocation2], %s402_s18 }
  0x38   : > { %603 = dma.done.wait (%p707_p8), %s179_s19, 512  }
  0x39   : > { %605 = vsyncadd (%p707_p8), %s179_s19, 4294966784  ;;  %s403_s5 = sshll.u32 %s768_s25, 3  ;;  %s188_s26 = scalar_lea.sflag [#allocation6], %s768_s25 }
  0x3a   : > { %s191_s27 = scalar_lea.vmem [#allocation5], %s403_s5 }
  0x3b   : > { %607 = dma.done.wait (%p707_p8), %s188_s26, 128  }
  0x3c   : > { %609 = vsyncadd (%p707_p8), %s188_s26, 4294967168  ;;  %s412_s28 = smul.u32 24, %s768_s25  ;;  %v224_v0 = vld [vmem:[%s182_s20] sm:$0xff]  ;;  %v225_v1 = vld [vmem:[%s182_s20 + $0x8] sm:$0xff]  ;;  %v246_v18 = vlaneseq  ;;  %s272_s16 = scalar_lea.sflag [#allocation4], %s768_s25 }
  0x3d   : > { %v226_v2 = vld [vmem:[%s182_s20 + $0x10] sm:$0xff]  ;;  %v227_v3 = vld [vmem:[%s182_s20 + $0x18] sm:$0xff]  ;;  %v228_v4 = vsub.f32 %v224_v0, %v225_v1  ;;  %v229_v5 = vsub.f32 %v225_v1, %v225_v1  ;;  %v244_v7 = vld [vmem:[%s191_s27] sm:$0xff]  ;;  %s413_s21 = smul.u32 384, %s628_s12  ;;  %s642_s12 = smov [#allocation7]  }
  0x3e   : > { %v230_v6 = vsub.f32 %v226_v2, %v225_v1  ;;  %v231_v8 = vsub.f32 %v227_v3, %v225_v1  ;;  %s216_s29 = scalar_lea.vmem [#allocation7], %s412_s28  ;;  %v247_v21 = vshrl.u32 %v246_v18, 7  ;;  %v249_v22 = vand.u32 127, %v246_v18  ;;  %s556_s4 = sshll.u32 %s642_s12, 4  ;;  %s557_s4 = int_to_ptr.vmem [resolvable:$false] %s556_s4 }
  0x3f   : > { %v232_v9 = vmul.f32 1.442695, %v228_v4  ;;  %v234_v10 = vmul.f32 1.442695, %v229_v5  ;;  %405 = vst [vmem:[%s216_s29 + $0x8] sm:$0xff] %v244_v7  ;;  %s285_s3 = sshll.u32 %s216_s29, 4  ;;  %s787_s15 = scalar_lea.hbm %s839_s2, %s413_s21  ;;  %s789_s3 = int_to_ptr.vmem [resolvable:$true] %s285_s3 }
  0x40   : > { %v236_v11 = vmul.f32 1.442695, %v230_v6  ;;  %v238_v12 = vmul.f32 1.442695, %v231_v8  ;;  %v251_v23 = vmul.u32 128, %v247_v21  ;;  %s552_s30 = scalar_lea.vmem %s789_s3, 384  ;;  %p559_p5 = scmp.lt.s32.totalorder %s789_s3, %s557_s4 }
  0x41   : > { %486 = vpow2.f32 %v232_v9  ;;  %p553_p8 = scmp.ne.s32.totalorder %s789_s3, %s552_s30  ;;  %s558_s6 = scalar_lea.vmem %s557_s4, 768 }
  0x42   : > { %488 = vpow2.f32 %v234_v10  ;;  %v254_v24 = vadd.s32 %v251_v23, %v249_v22  ;;  %p560_p6 = scmp.lt.s32.totalorder %s558_s6, %s552_s30 }
  0x43   : > { %490 = vpow2.f32 %v236_v11  ;;  %p554_p0 = pnand %p553_p8, %p711_p9 }
  0x44   : > { %492 = vpow2.f32 %v238_v12  ;;  %vm255_vm0 = vcmp.lt.s32.totalorder %v254_v24, 256  ;;  %p561_p4 = por %p560_p6, %p559_p5 }
  0x45   : > { %p555_p2 = pneg %p554_p0 }
  0x47   : > { %p562_p7 = pnand %p561_p4, %p555_p2 }
  0x4e   : > { %v487_v13 = vpop.eup %486 }
  0x4f   : > { %v489_v14 = vpop.eup %488 }
  0x50   : > { %v491_v15 = vpop.eup %490  ;;  %v240_v16 = vadd.f32 %v489_v14, %v487_v13 }
  0x51   : > { %v493_v17 = vpop.eup %492 }
  0x52   : > { %v241_v19 = vadd.f32 %v491_v15, %v240_v16 }
  0x54   : > { %v242_v20 = vadd.f32 %v493_v17, %v241_v19 }
  0x56   : > { %494 = vrcp.f32 %v242_v20 }
  0x63   : > { %v495_v25 = vpop.eup %494 }
  0x64   : > { %v256_v26 = vsel %vm255_vm0, %v495_v25, 0.0  ;;  %v245_v27 = vmul.f32 %v495_v25, %v244_v7 }
  0x65   : > { %260 = vst [vmem:[%s216_s29] sm:$0xff] %v256_v26 }
  0x66   : > { %407 = vst [vmem:[%s216_s29 + $0x10] sm:$0xff] %v245_v27 }
  0x67   : > { %565 = shalt.err (!%p562_p7)
}
  0x68   : > { %s566_s18 = scalar_lea.hbm %s787_s15, 384  ;;  %s570_s5 = scalar_lea.hbm %s839_s2, 768 }
  0x69   : > { %p567_p1 = scmp.ne.s32.totalorder %s787_s15, %s566_s18  ;;  %p571_p3 = scmp.lt.s32.totalorder %s787_s15, %s839_s2 }
  0x6a   : > { %p572_p8 = scmp.lt.s32.totalorder %s570_s5, %s566_s18 }
  0x6b   : > { %p568_p10 = pnand %p567_p1, %p711_p9 }
  0x6c   : > { %p573_p0 = por %p572_p8, %p571_p3 }
  0x6d   : > { %p569_p13 = pneg %p568_p10 }
  0x6f   : > { %p574_p2 = pnand %p573_p0, %p569_p13 }
  0x71   : > { %577 = shalt.err (!%p574_p2)
}
  0x72   : > { %s643_s28 = smov 128   ;;  %s644_s29 = smov 8  }
  0x73   : > { %418 = dma.vmem_to_hbm [thread:$0]  (%p711_p9), %s789_s3, 384, %s787_s15, %s272_s16, %s643_s28, %s643_s28, %s644_s29  }
  0x74 PF: > { %s300_s21 = sand.u32 1, %s616_s9   ;;  %p428_p5 = pnand %p395_p12, %p718_p11 }
  0x75   : > { %s301_s7 = scalar_lea.sflag [#allocation4], %s300_s21 }
  0x76   : > { %p429_p6 = pneg %p428_p5 }
  0x78   : > { %611 = dma.done.wait (%p429_p6), %s301_s7, 384  }
  0x79   : > { %613 = vsyncadd (%p429_p6), %s301_s7, 4294966912  ;;  %s21_s14 = sadd.s32 1, %s636_s14   ;;  %s846_s9 = smov %s620_s10 }
  0x7a   : > { %p18_p4 = scmp.ge.s32.totalorder %s21_s14, 4   ;;  %s847_s10 = smov %s624_s11 }
  0x7b   : > { %s848_s11 = smov %s716_s23  ;;  %s849_s12 = smov %s632_s13 }
  0x7c   : > { %s850_s13 = smov %s852_s17  ;;  %20 = sbr.rel (!%p18_p4) target bundleno = 8 (0x8), region = 92 }
  0x81   :  { %306 = vsyncpa [#allocation3], 1 }
  0x82   :  { %308 = vsyncpa [#allocation3 + $0x1], 1 }
  0x83   :  { %309 = vsyncpa [#allocation6], 1 }
  0x84   :  { %311 = vsyncpa [#allocation6 + $0x1], 1 }
  0x85   :  { %312 = vsyncpa [#allocation4], 1 }
  0x86   :  { %314 = vsyncpa [#allocation4 + $0x1], 1 }

</bundles_post_ra>
